<compile_context>
chip_gen: v6e
topology: v6e:2x2x1
jax: 0.10.0
libtpu: 0.0.40
codegen_flags: <defaults>
</compile_context>

<pallas_src>
import jax
import jax.numpy as jnp
from jax.experimental import pallas as pl
from jax.experimental.pallas import tpu as pltpu


# Inputs smaller than this (bytes) go through plain XLA (launch overhead dominates).
_MIN_PALLAS_BYTES = 1 << 17          # 128 KiB
# Per-buffer tile target. in + out, each double-buffered => ~4x this in VMEM.
_TARGET_TILE_BYTES = 4 << 20         # 4 MiB
_VMEM_LIMIT_BYTES = 32 * 1024 * 1024 # safe on v5e/v6e (128 MiB phys) and v7x (64 MiB phys)


def _bias_add_kernel(bias_ref, x_ref, o_ref):
    # bias_ref: SMEM (1,) float32 scalar; x_ref / o_ref: VMEM tiles of x.dtype.
    # Single scalar cast -> the whole-tile add stays in x.dtype (no f32 promotion).
    b = bias_ref[0].astype(o_ref.dtype)
    o_ref[...] = x_ref[...] + b


def _choose_lanes(n_elem):
    for cand in (2048, 1024, 512, 256, 128):
        if n_elem % cand == 0:
            return cand
    return 0  # not a multiple of 128 -> caller falls back to XLA


def _choose_tile_rows(rows, lanes, itemsize):
    # Sublane packing of the dtype: 8 rows (32-bit), 16 (16-bit), 32 (8-bit).
    pack = 8 * max(1, 4 // max(1, itemsize))
    if rows <= pack:
        return rows  # single full-extent block (block dim == full array dim is legal)

    # ~4 MiB per buffer amortizes the ~0.35 us per-grid-step overhead.
    target = max(pack, ((_TARGET_TILE_BYTES // (itemsize * lanes)) // pack) * pack)
    # Keep at least 2 grid steps so v7x's 2 TensorCores both get work.
    half = max(pack, (-(-rows // (2 * pack))) * pack)
    tile = min(target, half)

    # Prefer a tile that divides rows exactly (no ragged last block / masked vst).
    for cand in range(tile, pack - 1, -pack):
        if rows % cand == 0:
            return cand
    return tile  # ragged last block; Pallas masks out-of-bounds rows correctly


def bias_add(x, bias, *, donate_x=False):
    """Elementwise x + bias (bias: shape-(1,) scalar parameter)."""
    orig_shape = x.shape
    dtype = x.dtype
    n_elem = x.size
    itemsize = jnp.dtype(dtype).itemsize

    lanes = _choose_lanes(n_elem)

    # Early-out: tiny or non-128-multiple inputs -> fused XLA add is at roofline.
    if lanes == 0 or n_elem * itemsize < _MIN_PALLAS_BYTES:
        return x + jnp.asarray(bias, dtype=dtype).reshape(())

    rows = n_elem // lanes
    x2d = x.reshape(rows, lanes)

    tile_rows = _choose_tile_rows(rows, lanes, itemsize)
    grid = (pl.cdiv(rows, tile_rows),)

    extra_kwargs = {}
    if donate_x:
        # Alias x's buffer to the output (caller should donate x at the jit level).
        extra_kwargs["input_output_aliases"] = {1: 0}

    out2d = pl.pallas_call(
        _bias_add_kernel,
        out_shape=jax.ShapeDtypeStruct((rows, lanes), dtype),
        grid_spec=pltpu.PrefetchScalarGridSpec(
            num_scalar_prefetch=0,
            grid=grid,
            in_specs=[
                pl.BlockSpec(memory_space=pltpu.SMEM),               # f32 scalar bias
                pl.BlockSpec((tile_rows, lanes), lambda i: (i, 0)),  # x tile
            ],
            out_specs=pl.BlockSpec((tile_rows, lanes), lambda i: (i, 0)),
        ),
        compiler_params=pltpu.CompilerParams(
            dimension_semantics=("parallel",),
            vmem_limit_bytes=_VMEM_LIMIT_BYTES,
        ),
        **extra_kwargs,
    )(jnp.asarray(bias, dtype=jnp.float32).reshape(-1), x2d)

    return out2d.reshape(orig_shape)


if __name__ == "__main__":
    key = jax.random.PRNGKey(0)
    kx, kb, kx2 = jax.random.split(key, 3)

    # Module's single-scalar bias parameter (torch.randn(1) semantics).
    bias = jax.random.normal(kb, (1,), dtype=jnp.float32)

    # Small conv-style tensor consistent with the module (takes the XLA early-out).
    x_small = jax.random.normal(kx, (2, 4, 16, 16), dtype=jnp.float32)
    out_small = bias_add(x_small, bias)
    jax.block_until_ready(out_small)
    assert out_small.shape == x_small.shape
    assert jnp.allclose(out_small, x_small + bias[0], atol=1e-6), "small f32 mismatch"

    # Larger activation that exercises the Pallas kernel path (grid of >= 2 steps).
    x_big = jax.random.normal(kx2, (2, 4, 128, 128), dtype=jnp.float32)
    out_big = bias_add(x_big, bias)
    jax.block_until_ready(out_big)
    assert out_big.shape == x_big.shape
    assert jnp.allclose(out_big, x_big + bias[0], atol=1e-6), "big f32 mismatch"

    # bf16 path through the kernel: add stays in bf16 (no full-tile f32 promotion),
    # output dtype follows x.dtype.
    x_bf16 = x_big.astype(jnp.bfloat16)
    out_bf16 = bias_add(x_bf16, bias)
    jax.block_until_ready(out_bf16)
    ref_bf16 = x_bf16 + jnp.asarray(bias, dtype=jnp.bfloat16)[0]
    assert out_bf16.dtype == jnp.bfloat16
    assert jnp.allclose(out_bf16.astype(jnp.float32),
                        ref_bf16.astype(jnp.float32), atol=1e-2), "bf16 mismatch"

    print("KERNEL_OK")
</pallas_src>

<mosaic_0001>
module attributes {stable_mosaic.version = 11 : i64} {
  func.func @_bias_add_kernel(%arg0: i32, %arg1: memref<1xf32, #tpu.memory_space<smem>>, %arg2: memref<32x2048xf32, #tpu.memory_space<vmem>>, %arg3: memref<32x2048xf32, #tpu.memory_space<vmem>>) attributes {dimension_semantics = [#tpu.dimension_semantics<parallel>], iteration_bounds = array<i64: 2>, scalar_prefetch = 0 : i64, scratch_operands = 0 : i64, tpu.core_type = #tpu.core_type<tc>, window_params = [{transform_indices = @transform_0, window_bounds = array<i64: 1>}, {transform_indices = @transform_1, window_bounds = array<i64: 32, 2048>}, {transform_indices = @transform_2, window_bounds = array<i64: 32, 2048>}]} {
    %c0 = arith.constant 0 : index
    %0 = memref.load %arg1[%c0] : memref<1xf32, #tpu.memory_space<smem>>
    %c0_0 = arith.constant 0 : index
    %c0_1 = arith.constant 0 : index
    %1 = vector.load %arg2[%c0_0, %c0_1] : memref<32x2048xf32, #tpu.memory_space<vmem>>, vector<32x2048xf32>
    %2 = vector.broadcast %0 : f32 to vector<32x2048xf32>
    %3 = arith.addf %1, %2 : vector<32x2048xf32>
    %c0_2 = arith.constant 0 : index
    %c0_3 = arith.constant 0 : index
    %4 = vector.load %arg3[%c0_2, %c0_3] : memref<32x2048xf32, #tpu.memory_space<vmem>>, vector<32x2048xf32>
    tpu.vector_store %arg3[%c0_2, %c0_3], %3 {strides = array<i32>} : memref<32x2048xf32, #tpu.memory_space<vmem>>, vector<32x2048xf32>,
    return
  }
  func.func @transform_0(%arg0: i32) -> i32 {
    %c0_i32 = arith.constant 0 : i32
    %c0_i32_0 = arith.constant 0 : i32
    return %c0_i32 : i32
  }
  func.func @transform_1(%arg0: i32) -> (i32, i32) {
    %c0_i32 = arith.constant 0 : i32
    %c0_i32_0 = arith.constant 0 : i32
    return %arg0, %c0_i32 : i32, i32
  }
  func.func @transform_2(%arg0: i32) -> (i32, i32) {
    %c0_i32 = arith.constant 0 : i32
    %c0_i32_0 = arith.constant 0 : i32
    return %arg0, %c0_i32 : i32, i32
  }
}

</mosaic_0001>

<bundles_post_ra>
// kernel: tpu_custom_call.1
= control target key start
LH: loop header
LB: loop body
LE: loop exit
PB: predicated region body
PF: predicated region fallthrough
CT: control target
= control target key end

     0   :  { %s989_s0 = inlined_call_operand.<no memory space> [shape: f32[1], index: 0, kind: input, shape index: {}]   ;;  %s990_s1 = inlined_call_operand.hbm [shape: f32[64,2048], index: 1, kind: input, shape index: {}]   ;;  %s991_s2 = inlined_call_operand.hbm [shape: f32[64,2048], index: 2, kind: output, shape index: {}]  }
   0x1   :  { %7 = sst [smem:[#allocation2]] %s989_s0 }
   0x2   :  { %8 = vsyncpa [#allocation4], 0 }
   0x3   :  { %10 = vsyncpa [#allocation4 + $0x1], 0 }
   0x4   :  { %11 = vsyncpa [#allocation5], 0 }
   0x5   :  { %13 = vsyncpa [#allocation5 + $0x1], 0  ;;  %s636_s11 = smov 0   ;;  %s638_s12 = smov 0  }
   0x6   :  { %s640_s13 = smov 0   ;;  %s642_s14 = smov 0  }
   0x7 LB: > { %s657_s0 = sadd.s32 4294967295, %s610_s14   ;;  %s448_s15 = sadd.s32 4294967294, %s610_s14   ;;  %s610_s14 = sphi %s642_s14, %s1006_s14   ;;  %s606_s13 = sphi %s640_s13, %s1005_s13   ;;  %s602_s12 = sphi %s638_s12, %s1004_s12   ;;  %s598_s11 = sphi %s636_s11, %s1003_s11  }
   0x8   : > { %s661_s16 = sadd.s32 1, %s610_s14   ;;  %s47_s17 = sadd.s32 1, %s606_s13 }
   0x9   : > { %s44_s18 = ssub.s32 %s610_s14, %s661_s16  ;;  %p54_p0 = scmp.ne.s32.totalorder %s606_s13, %s602_s12 }
   0xa   : > { %p45_p1 = scmp.eq.s32.totalorder %s44_s18, 0  ;;  %p55_p2 = scmp.eq.s32.totalorder %s610_s14, 0 }
   0xb   : > { %p60_p3 = scmp.ne.s32.totalorder %s602_s12, %s598_s11  ;;  %p61_p4 = scmp.eq.s32.totalorder %s657_s0, 0 }
   0xc   : > { %s673_s19 = scalar_select %p45_p1, %s606_s13, %s47_s17  }
   0xd   : > { %p675_p5 = por %p55_p2, %p54_p0  ;;  %p679_p6 = por %p61_p4, %p60_p3 }
   0xe   : > { %p84_p7 = scmp.eq.s32.totalorder %s657_s0, 1  ;;  %p90_p8 = scmp.eq.s32.totalorder %s448_s15, 1 }
   0xf   : > { %s995_s21 = scalar_select %p679_p6, 1, 0 }
  0x10   : > { %p480_p10 = scmp.lt.s32.totalorder %s610_s14, 2  ;;  %p686_p11 = por %p84_p7, %p54_p0 }
  0x11   : > { %p690_p12 = por %p90_p8, %p60_p3  ;;  %s113_s24 = sand.u32 1, %s606_s13  }
  0x12   : > { %s996_s22 = scalar_select %p686_p11, 1, 0 }
  0x13   : > { %s997_s23 = scalar_select %p690_p12, 1, 0 }
  0x14   : > { %s465_s25 = sshll.u32 %s610_s14, 13  ;;  %s451_s26 = sshll.u32 %s113_s24, 9 }
  0x15   : > { %s699_s29 = scalar_lea.hbm %s990_s1, %s465_s25  ;;  %s117_s30 = scalar_lea.vmem [#allocation3], %s451_s26 }
  0x16   : > { %s125_s3 = sshll.u32 %s117_s30, 4  ;;  %p703_p13 = pnand %p480_p10, %p675_p5  ;;  %s707_s3 = int_to_ptr.vmem [resolvable:$true] %s125_s3 }
  0x17   : > { %s709_s5 = scalar_lea.sflag [#allocation4], %s113_s24  ;;  %s518_s6 = scalar_lea.hbm %s699_s29, 8192 }
  0x18   : > { %p519_p0 = scmp.ne.s32.totalorder %s699_s29, %s518_s6  ;;  %p520_p1 = pneg %p703_p13 }
  0x19   : > { %s523_s9 = scalar_lea.hbm %s990_s1, 16384  ;;  %p524_p4 = scmp.lt.s32.totalorder %s699_s29, %s990_s1 }
  0x1a   : > { %p521_p2 = pnand %p520_p1, %p519_p0  ;;  %p525_p5 = scmp.lt.s32.totalorder %s523_s9, %s518_s6 }
  0x1c   : > { %p522_p3 = pneg %p521_p2  ;;  %p526_p7 = por %p525_p5, %p524_p4 }
  0x1e   : > { %p527_p8 = pnand %p526_p7, %p522_p3 }
  0x20   : > { %530 = shalt.err (!%p527_p8)
}
  0x21   : > { %s531_s17 = scalar_lea.vmem %s707_s3, 8192  ;;  %s612_s18 = smov [#allocation3]  }
  0x22   : > { %p532_p10 = scmp.ne.s32.totalorder %s707_s3, %s531_s17  ;;  %s536_s20 = sshll.u32 %s612_s18, 4  ;;  %s537_s20 = int_to_ptr.vmem [resolvable:$false] %s536_s20 }
  0x23   : > { %s538_s24 = scalar_lea.vmem %s537_s20, 16384  ;;  %p539_p2 = scmp.lt.s32.totalorder %s707_s3, %s537_s20 }
  0x24   : > { %p534_p9 = pnand %p532_p10, %p520_p1  ;;  %p540_p12 = scmp.lt.s32.totalorder %s538_s24, %s531_s17 }
  0x26   : > { %p535_p0 = pneg %p534_p9  ;;  %p541_p11 = por %p540_p12, %p539_p2 }
  0x28   : > { %p542_p6 = pnand %p541_p11, %p535_p0 }
  0x2a   : > { %545 = shalt.err (!%p542_p6)
}
  0x2b   : > { %s613_s25 = smov 2048   ;;  %s614_s26 = smov 128  }
  0x2c   : > { %475 = dma.hbm_to_vmem [thread:$0]  (!%p703_p13), %s699_s29, 8192, %s707_s3, %s709_s5, %s613_s25, %s613_s25, %s614_s26  }
  0x2d   : > { %p455_p9 = scmp.ge.s32.totalorder %s610_s14, 1  ;;  %p133_p1 = scmp.lt.s32.totalorder %s610_s14, 3 }
  0x2f   : > { %p134_p3 = pnand %p455_p9, %p133_p1 }
  0x30   : > { %s733_s27 = sand.u32 (!%p134_p3), 1, %s602_s12   ;;  %p999_p6 = scmp.ne.s32.totalorder (!%p134_p3), %s995_s21, 0 }
  0x31   : > { %137 = sbr.rel (%p134_p3) target bundleno = 109 (0x6d), region = 28  ;;  %s456_s28 = sshll.u32 (!%p134_p3), %s733_s27, 9 }
  0x32   : > { %s140_s30 = scalar_lea.sflag (!%p134_p3), [#allocation4], %s733_s27  ;;  %s737_s6 = scalar_lea.vmem (!%p134_p3), [#allocation3], %s456_s28 }
  0x36   : > { %589 = dma.done.wait (%p999_p6), %s140_s30, 8192  }
  0x37   : > { %591 = vsyncadd (%p999_p6), %s140_s30, 4294959104  ;;  %s166_s29 = sld [smem:[#allocation2]]  ;;  %v167_v0 = vld [vmem:[%s737_s6] sm:$0xff]  ;;  %v168_v2 = vld [vmem:[%s737_s6 + $0x8] sm:$0xff]  ;;  %s760_s21 = scalar_lea.vmem [#allocation6], %s456_s28 }
  0x38   : > { %v169_v3 = vld [vmem:[%s737_s6 + $0x10] sm:$0xff]  ;;  %v170_v7 = vld [vmem:[%s737_s6 + $0x18] sm:$0xff]  ;;  %v171_v8 = vld [vmem:[%s737_s6 + $0x20] sm:$0xff]  ;;  %s467_s3 = sshll.u32 %s657_s0, 13  ;;  %s375_s4 = sshll.u32 %s760_s21, 4  ;;  %s938_s4 = int_to_ptr.vmem [resolvable:$true] %s375_s4 }
  0x39   : > { %v172_v9 = vld [vmem:[%s737_s6 + $0x28] sm:$0xff]  ;;  %v173_v13 = vld [vmem:[%s737_s6 + $0x30] sm:$0xff]  ;;  %v174_v14 = vld [vmem:[%s737_s6 + $0x38] sm:$0xff]  ;;  %s936_s7 = scalar_lea.hbm %s991_s2, %s467_s3  ;;  %s361_s8 = scalar_lea.sflag [#allocation5], %s733_s27 }
  0x3a   : > { %v175_v15 = vld [vmem:[%s737_s6 + $0x40] sm:$0xff]  ;;  %v176_v19 = vld [vmem:[%s737_s6 + $0x48] sm:$0xff]  ;;  %v177_v20 = vld [vmem:[%s737_s6 + $0x50] sm:$0xff]  ;;  %s546_s9 = scalar_lea.vmem %s938_s4, 8192  ;;  %p1000_p12 = scmp.ne.s32.totalorder %s996_s22, 0 }
  0x3b   : > { %v178_v21 = vld [vmem:[%s737_s6 + $0x58] sm:$0xff]  ;;  %v179_v25 = vld [vmem:[%s737_s6 + $0x60] sm:$0xff]  ;;  %v180_v26 = vld [vmem:[%s737_s6 + $0x68] sm:$0xff]  ;;  %p547_p11 = scmp.ne.s32.totalorder %s938_s4, %s546_s9  ;;  %s615_s10 = smov [#allocation6]  }
  0x3c   : > { %v181_v27 = vld [vmem:[%s737_s6 + $0x70] sm:$0xff]  ;;  %v182_v31 = vld [vmem:[%s737_s6 + $0x78] sm:$0xff]  ;;  %v183_v32 = vld [vmem:[%s737_s6 + $0x80] sm:$0xff]  ;;  %s550_s15 = sshll.u32 %s615_s10, 4  ;;  %s551_s15 = int_to_ptr.vmem [resolvable:$false] %s550_s15 }
  0x3d   : > { %v744_v1 = vstv %s166_s29  ;;  %v184_v33 = vld [vmem:[%s737_s6 + $0x88] sm:$0xff]  ;;  %v185_v37 = vld [vmem:[%s737_s6 + $0x90] sm:$0xff]  ;;  %v186_v38 = vld [vmem:[%s737_s6 + $0x98] sm:$0xff]  ;;  %p548_p13 = pnand %p547_p11, %p1000_p12  ;;  %s552_s17 = scalar_lea.vmem %s551_s15, 16384 }
  0x3e   : > { %v232_v4 = vadd.f32 %v744_v1, %v167_v0  ;;  %v233_v5 = vadd.f32 %v744_v1, %v168_v2  ;;  %v234_v6 = vadd.f32 %v744_v1, %v169_v3  ;;  %v235_v10 = vadd.f32 %v744_v1, %v170_v7  ;;  %v187_v39 = vld [vmem:[%s737_s6 + $0xa0] sm:$0xff]  ;;  %v188_v43 = vld [vmem:[%s737_s6 + $0xa8] sm:$0xff]  ;;  %v189_v44 = vld [vmem:[%s737_s6 + $0xb0] sm:$0xff]  ;;  %p553_p5 = scmp.lt.s32.totalorder %s938_s4, %s551_s15  ;;  %p554_p7 = scmp.lt.s32.totalorder %s552_s17, %s546_s9 }
  0x3f   : > { %v236_v11 = vadd.f32 %v744_v1, %v171_v8  ;;  %v237_v12 = vadd.f32 %v744_v1, %v172_v9  ;;  %v238_v16 = vadd.f32 %v744_v1, %v173_v13  ;;  %v239_v17 = vadd.f32 %v744_v1, %v174_v14  ;;  %v190_v45 = vld [vmem:[%s737_s6 + $0xb8] sm:$0xff]  ;;  %v191_v49 = vld [vmem:[%s737_s6 + $0xc0] sm:$0xff]  ;;  %v192_v50 = vld [vmem:[%s737_s6 + $0xc8] sm:$0xff]  ;;  %p549_p4 = pneg %p548_p13 }
  0x40   : > { %296 = vst [vmem:[%s760_s21] sm:$0xff] %v232_v4  ;;  %297 = vst [vmem:[%s760_s21 + $0x8] sm:$0xff] %v233_v5  ;;  %v240_v18 = vadd.f32 %v744_v1, %v175_v15  ;;  %v241_v22 = vadd.f32 %v744_v1, %v176_v19  ;;  %v242_v23 = vadd.f32 %v744_v1, %v177_v20  ;;  %v193_v51 = vld [vmem:[%s737_s6 + $0xd0] sm:$0xff]  ;;  %v194_v55 = vld [vmem:[%s737_s6 + $0xd8] sm:$0xff]  ;;  %p555_p8 = por %p554_p7, %p553_p5 }
  0x41   : > { %298 = vst [vmem:[%s760_s21 + $0x10] sm:$0xff] %v234_v6  ;;  %299 = vst [vmem:[%s760_s21 + $0x18] sm:$0xff] %v235_v10  ;;  %v243_v24 = vadd.f32 %v744_v1, %v178_v21  ;;  %v244_v28 = vadd.f32 %v744_v1, %v179_v25  ;;  %v245_v29 = vadd.f32 %v744_v1, %v180_v26  ;;  %v195_v56 = vld [vmem:[%s737_s6 + $0xe0] sm:$0xff]  ;;  %v196_v57 = vld [vmem:[%s737_s6 + $0xe8] sm:$0xff] }
  0x42   : > { %300 = vst [vmem:[%s760_s21 + $0x20] sm:$0xff] %v236_v11  ;;  %301 = vst [vmem:[%s760_s21 + $0x28] sm:$0xff] %v237_v12  ;;  %v246_v30 = vadd.f32 %v744_v1, %v181_v27  ;;  %v247_v34 = vadd.f32 %v744_v1, %v182_v31  ;;  %v248_v35 = vadd.f32 %v744_v1, %v183_v32  ;;  %v197_v61 = vld [vmem:[%s737_s6 + $0xf0] sm:$0xff]  ;;  %v198_v62 = vld [vmem:[%s737_s6 + $0xf8] sm:$0xff]  ;;  %p556_p10 = pnand %p555_p8, %p549_p4 }
  0x43   : > { %302 = vst [vmem:[%s760_s21 + $0x30] sm:$0xff] %v238_v16  ;;  %303 = vst [vmem:[%s760_s21 + $0x38] sm:$0xff] %v239_v17  ;;  %v249_v36 = vadd.f32 %v744_v1, %v184_v33  ;;  %v250_v40 = vadd.f32 %v744_v1, %v185_v37  ;;  %v251_v41 = vadd.f32 %v744_v1, %v186_v38  ;;  %v199_v63 = vld [vmem:[%s737_s6 + $0x100] sm:$0xff]  ;;  %v200_v4 = vld [vmem:[%s737_s6 + $0x108] sm:$0xff] }
  0x44   : > { %304 = vst [vmem:[%s760_s21 + $0x40] sm:$0xff] %v240_v18  ;;  %305 = vst [vmem:[%s760_s21 + $0x48] sm:$0xff] %v241_v22  ;;  %v252_v42 = vadd.f32 %v744_v1, %v187_v39  ;;  %v253_v46 = vadd.f32 %v744_v1, %v188_v43  ;;  %v254_v47 = vadd.f32 %v744_v1, %v189_v44  ;;  %v201_v5 = vld [vmem:[%s737_s6 + $0x110] sm:$0xff]  ;;  %v202_v6 = vld [vmem:[%s737_s6 + $0x118] sm:$0xff] }
  0x45   : > { %306 = vst [vmem:[%s760_s21 + $0x50] sm:$0xff] %v242_v23  ;;  %307 = vst [vmem:[%s760_s21 + $0x58] sm:$0xff] %v243_v24  ;;  %v255_v48 = vadd.f32 %v744_v1, %v190_v45  ;;  %v256_v52 = vadd.f32 %v744_v1, %v191_v49  ;;  %v257_v53 = vadd.f32 %v744_v1, %v192_v50  ;;  %v203_v10 = vld [vmem:[%s737_s6 + $0x120] sm:$0xff]  ;;  %v204_v11 = vld [vmem:[%s737_s6 + $0x128] sm:$0xff] }
  0x46   : > { %308 = vst [vmem:[%s760_s21 + $0x60] sm:$0xff] %v244_v28  ;;  %309 = vst [vmem:[%s760_s21 + $0x68] sm:$0xff] %v245_v29  ;;  %v258_v54 = vadd.f32 %v744_v1, %v193_v51  ;;  %v259_v58 = vadd.f32 %v744_v1, %v194_v55  ;;  %v260_v59 = vadd.f32 %v744_v1, %v195_v56  ;;  %v205_v12 = vld [vmem:[%s737_s6 + $0x130] sm:$0xff]  ;;  %v206_v16 = vld [vmem:[%s737_s6 + $0x138] sm:$0xff] }
  0x47   : > { %310 = vst [vmem:[%s760_s21 + $0x70] sm:$0xff] %v246_v30  ;;  %311 = vst [vmem:[%s760_s21 + $0x78] sm:$0xff] %v247_v34  ;;  %v261_v60 = vadd.f32 %v744_v1, %v196_v57  ;;  %v262_v0 = vadd.f32 %v744_v1, %v197_v61  ;;  %v263_v2 = vadd.f32 %v744_v1, %v198_v62  ;;  %v207_v17 = vld [vmem:[%s737_s6 + $0x140] sm:$0xff]  ;;  %v208_v18 = vld [vmem:[%s737_s6 + $0x148] sm:$0xff] }
  0x48   : > { %312 = vst [vmem:[%s760_s21 + $0x80] sm:$0xff] %v248_v35  ;;  %313 = vst [vmem:[%s760_s21 + $0x88] sm:$0xff] %v249_v36  ;;  %v264_v3 = vadd.f32 %v744_v1, %v199_v63  ;;  %v265_v7 = vadd.f32 %v744_v1, %v200_v4  ;;  %v266_v8 = vadd.f32 %v744_v1, %v201_v5  ;;  %v209_v22 = vld [vmem:[%s737_s6 + $0x150] sm:$0xff]  ;;  %v210_v23 = vld [vmem:[%s737_s6 + $0x158] sm:$0xff] }
  0x49   : > { %314 = vst [vmem:[%s760_s21 + $0x90] sm:$0xff] %v250_v40  ;;  %315 = vst [vmem:[%s760_s21 + $0x98] sm:$0xff] %v251_v41  ;;  %v267_v9 = vadd.f32 %v744_v1, %v202_v6  ;;  %v268_v13 = vadd.f32 %v744_v1, %v203_v10  ;;  %v269_v14 = vadd.f32 %v744_v1, %v204_v11  ;;  %v211_v24 = vld [vmem:[%s737_s6 + $0x160] sm:$0xff]  ;;  %v212_v28 = vld [vmem:[%s737_s6 + $0x168] sm:$0xff] }
  0x4a   : > { %316 = vst [vmem:[%s760_s21 + $0xa0] sm:$0xff] %v252_v42  ;;  %317 = vst [vmem:[%s760_s21 + $0xa8] sm:$0xff] %v253_v46  ;;  %v270_v15 = vadd.f32 %v744_v1, %v205_v12  ;;  %v271_v19 = vadd.f32 %v744_v1, %v206_v16  ;;  %v272_v20 = vadd.f32 %v744_v1, %v207_v17  ;;  %v213_v29 = vld [vmem:[%s737_s6 + $0x170] sm:$0xff]  ;;  %v214_v30 = vld [vmem:[%s737_s6 + $0x178] sm:$0xff] }
  0x4b   : > { %318 = vst [vmem:[%s760_s21 + $0xb0] sm:$0xff] %v254_v47  ;;  %319 = vst [vmem:[%s760_s21 + $0xb8] sm:$0xff] %v255_v48  ;;  %v273_v21 = vadd.f32 %v744_v1, %v208_v18  ;;  %v274_v25 = vadd.f32 %v744_v1, %v209_v22  ;;  %v275_v26 = vadd.f32 %v744_v1, %v210_v23  ;;  %v215_v34 = vld [vmem:[%s737_s6 + $0x180] sm:$0xff]  ;;  %v216_v35 = vld [vmem:[%s737_s6 + $0x188] sm:$0xff] }
  0x4c   : > { %320 = vst [vmem:[%s760_s21 + $0xc0] sm:$0xff] %v256_v52  ;;  %321 = vst [vmem:[%s760_s21 + $0xc8] sm:$0xff] %v257_v53  ;;  %v276_v27 = vadd.f32 %v744_v1, %v211_v24  ;;  %v277_v31 = vadd.f32 %v744_v1, %v212_v28  ;;  %v278_v32 = vadd.f32 %v744_v1, %v213_v29  ;;  %v217_v36 = vld [vmem:[%s737_s6 + $0x190] sm:$0xff]  ;;  %v218_v40 = vld [vmem:[%s737_s6 + $0x198] sm:$0xff] }
  0x4d   : > { %322 = vst [vmem:[%s760_s21 + $0xd0] sm:$0xff] %v258_v54  ;;  %323 = vst [vmem:[%s760_s21 + $0xd8] sm:$0xff] %v259_v58  ;;  %v279_v33 = vadd.f32 %v744_v1, %v214_v30  ;;  %v280_v37 = vadd.f32 %v744_v1, %v215_v34  ;;  %v281_v38 = vadd.f32 %v744_v1, %v216_v35  ;;  %v219_v41 = vld [vmem:[%s737_s6 + $0x1a0] sm:$0xff]  ;;  %v220_v42 = vld [vmem:[%s737_s6 + $0x1a8] sm:$0xff] }
  0x4e   : > { %324 = vst [vmem:[%s760_s21 + $0xe0] sm:$0xff] %v260_v59  ;;  %325 = vst [vmem:[%s760_s21 + $0xe8] sm:$0xff] %v261_v60  ;;  %v282_v39 = vadd.f32 %v744_v1, %v217_v36  ;;  %v283_v43 = vadd.f32 %v744_v1, %v218_v40  ;;  %v284_v44 = vadd.f32 %v744_v1, %v219_v41  ;;  %v221_v46 = vld [vmem:[%s737_s6 + $0x1b0] sm:$0xff]  ;;  %v222_v47 = vld [vmem:[%s737_s6 + $0x1b8] sm:$0xff] }
  0x4f   : > { %326 = vst [vmem:[%s760_s21 + $0xf0] sm:$0xff] %v262_v0  ;;  %327 = vst [vmem:[%s760_s21 + $0xf8] sm:$0xff] %v263_v2  ;;  %v285_v45 = vadd.f32 %v744_v1, %v220_v42  ;;  %v223_v48 = vld [vmem:[%s737_s6 + $0x1c0] sm:$0xff]  ;;  %v286_v49 = vadd.f32 %v744_v1, %v221_v46  ;;  %v287_v50 = vadd.f32 %v744_v1, %v222_v47  ;;  %v224_v52 = vld [vmem:[%s737_s6 + $0x1c8] sm:$0xff] }
  0x50   : > { %328 = vst [vmem:[%s760_s21 + $0x100] sm:$0xff] %v264_v3  ;;  %329 = vst [vmem:[%s760_s21 + $0x108] sm:$0xff] %v265_v7  ;;  %v288_v51 = vadd.f32 %v744_v1, %v223_v48  ;;  %v225_v53 = vld [vmem:[%s737_s6 + $0x1d0] sm:$0xff]  ;;  %v226_v54 = vld [vmem:[%s737_s6 + $0x1d8] sm:$0xff]  ;;  %v289_v55 = vadd.f32 %v744_v1, %v224_v52 }
  0x51   : > { %330 = vst [vmem:[%s760_s21 + $0x110] sm:$0xff] %v266_v8  ;;  %331 = vst [vmem:[%s760_s21 + $0x118] sm:$0xff] %v267_v9  ;;  %v290_v56 = vadd.f32 %v744_v1, %v225_v53  ;;  %v291_v57 = vadd.f32 %v744_v1, %v226_v54  ;;  %v227_v58 = vld [vmem:[%s737_s6 + $0x1e0] sm:$0xff]  ;;  %v228_v59 = vld [vmem:[%s737_s6 + $0x1e8] sm:$0xff] }
  0x52   : > { %332 = vst [vmem:[%s760_s21 + $0x120] sm:$0xff] %v268_v13  ;;  %333 = vst [vmem:[%s760_s21 + $0x128] sm:$0xff] %v269_v14  ;;  %v229_v60 = vld [vmem:[%s737_s6 + $0x1f0] sm:$0xff]  ;;  %v292_v61 = vadd.f32 %v744_v1, %v227_v58  ;;  %v293_v62 = vadd.f32 %v744_v1, %v228_v59  ;;  %v230_v0 = vld [vmem:[%s737_s6 + $0x1f8] sm:$0xff] }
  0x53   : > { %334 = vst [vmem:[%s760_s21 + $0x130] sm:$0xff] %v270_v15  ;;  %335 = vst [vmem:[%s760_s21 + $0x138] sm:$0xff] %v271_v19  ;;  %v294_v63 = vadd.f32 %v744_v1, %v229_v60  ;;  %v295_v2 = vadd.f32 %v744_v1, %v230_v0 }
  0x54   : > { %336 = vst [vmem:[%s760_s21 + $0x140] sm:$0xff] %v272_v20  ;;  %337 = vst [vmem:[%s760_s21 + $0x148] sm:$0xff] %v273_v21 }
  0x55   : > { %338 = vst [vmem:[%s760_s21 + $0x150] sm:$0xff] %v274_v25  ;;  %339 = vst [vmem:[%s760_s21 + $0x158] sm:$0xff] %v275_v26 }
  0x56   : > { %340 = vst [vmem:[%s760_s21 + $0x160] sm:$0xff] %v276_v27  ;;  %341 = vst [vmem:[%s760_s21 + $0x168] sm:$0xff] %v277_v31 }
  0x57   : > { %342 = vst [vmem:[%s760_s21 + $0x170] sm:$0xff] %v278_v32  ;;  %343 = vst [vmem:[%s760_s21 + $0x178] sm:$0xff] %v279_v33 }
  0x58   : > { %344 = vst [vmem:[%s760_s21 + $0x180] sm:$0xff] %v280_v37  ;;  %345 = vst [vmem:[%s760_s21 + $0x188] sm:$0xff] %v281_v38 }
  0x59   : > { %346 = vst [vmem:[%s760_s21 + $0x190] sm:$0xff] %v282_v39  ;;  %347 = vst [vmem:[%s760_s21 + $0x198] sm:$0xff] %v283_v43 }
  0x5a   : > { %348 = vst [vmem:[%s760_s21 + $0x1a0] sm:$0xff] %v284_v44  ;;  %349 = vst [vmem:[%s760_s21 + $0x1a8] sm:$0xff] %v285_v45 }
  0x5b   : > { %350 = vst [vmem:[%s760_s21 + $0x1b0] sm:$0xff] %v286_v49  ;;  %351 = vst [vmem:[%s760_s21 + $0x1b8] sm:$0xff] %v287_v50 }
  0x5c   : > { %352 = vst [vmem:[%s760_s21 + $0x1c0] sm:$0xff] %v288_v51  ;;  %353 = vst [vmem:[%s760_s21 + $0x1c8] sm:$0xff] %v289_v55 }
  0x5d   : > { %354 = vst [vmem:[%s760_s21 + $0x1d0] sm:$0xff] %v290_v56  ;;  %355 = vst [vmem:[%s760_s21 + $0x1d8] sm:$0xff] %v291_v57 }
  0x5e   : > { %356 = vst [vmem:[%s760_s21 + $0x1e0] sm:$0xff] %v292_v61  ;;  %357 = vst [vmem:[%s760_s21 + $0x1e8] sm:$0xff] %v293_v62 }
  0x5f   : > { %358 = vst [vmem:[%s760_s21 + $0x1f0] sm:$0xff] %v294_v63  ;;  %359 = vst [vmem:[%s760_s21 + $0x1f8] sm:$0xff] %v295_v2 }
  0x60   : > { %559 = shalt.err (!%p556_p10)
}
  0x61   : > { %s560_s18 = scalar_lea.hbm %s936_s7, 8192  ;;  %s564_s25 = scalar_lea.hbm %s991_s2, 16384 }
  0x62   : > { %p561_p0 = scmp.ne.s32.totalorder %s936_s7, %s560_s18  ;;  %p565_p1 = scmp.lt.s32.totalorder %s936_s7, %s991_s2 }
  0x63   : > { %p566_p3 = scmp.lt.s32.totalorder %s564_s25, %s560_s18 }
  0x64   : > { %p562_p2 = pnand %p561_p0, %p1000_p12 }
  0x65   : > { %p567_p6 = por %p566_p3, %p565_p1 }
  0x66   : > { %p563_p9 = pneg %p562_p2 }
  0x68   : > { %p568_p11 = pnand %p567_p6, %p563_p9 }
  0x6a   : > { %571 = shalt.err (!%p568_p11)
}
  0x6b   : > { %s616_s30 = smov 2048   ;;  %s617_s6 = smov 128  }
  0x6c   : > { %470 = dma.vmem_to_hbm [thread:$0]  (%p1000_p12), %s938_s4, 8192, %s936_s7, %s361_s8, %s616_s30, %s616_s30, %s617_s6  }
  0x6d PF: > { %s390_s29 = sand.u32 1, %s598_s11   ;;  %p1001_p13 = scmp.ne.s32.totalorder %s997_s23, 0 }
  0x6e   : > { %p1002_p4 = scmp.ge.s32.totalorder %s610_s14, 2  ;;  %s391_s21 = scalar_lea.sflag [#allocation5], %s390_s29 }
  0x70   : > { %p477_p5 = pnand %p1002_p4, %p1001_p13 }
  0x72   : > { %p478_p7 = pneg %p477_p5 }
  0x74   : > { %593 = dma.done.wait (%p478_p7), %s391_s21, 8192  }
  0x75   : > { %595 = vsyncadd (%p478_p7), %s391_s21, 4294959104  ;;  %p16_p8 = scmp.ge.s32.totalorder %s661_s16, 4   ;;  %s1003_s11 = smov %s602_s12 }
  0x76   : > { %s1004_s12 = smov %s606_s13  ;;  %s1005_s13 = smov %s673_s19 }
  0x77   : > { %s1006_s14 = smov %s661_s16  ;;  %18 = sbr.rel (!%p16_p8) target bundleno = 7 (0x7), region = 73 }
  0x7c   :  { %396 = vsyncpa [#allocation4], 1 }
  0x7d   :  { %398 = vsyncpa [#allocation4 + $0x1], 1 }
  0x7e   :  { %399 = vsyncpa [#allocation5], 1 }
  0x7f   :  { %401 = vsyncpa [#allocation5 + $0x1], 1 }

</bundles_post_ra>
